<compile_context>
chip_gen: v6e
topology: v6e:2x2x1
jax: 0.10.0
libtpu: 0.0.40
codegen_flags: <defaults>
</compile_context>

<pallas_src>
import math
import jax
import jax.numpy as jnp
from jax.experimental import pallas as pl
from jax.experimental.pallas import tpu as pltpu


def _round_up(x, m):
    return ((x + m - 1) // m) * m


# -----------------------------------------------------------------------------
# Pallas kernel: fused linear tile  o = x @ w + b   (all f32, MXU accumulate)
#   x_ref : (BM, D)   f32 activation tile (streamed / double-buffered)
#   w_ref : (D, C)    f32 weight, (in, out) layout — VMEM-resident
#   b_ref : (1, C)    f32 bias row                 — VMEM-resident
#   o_ref : (BM, C)   f32 logits tile (C == full array dim, unpadded)
# -----------------------------------------------------------------------------
def _linear_kernel(x_ref, w_ref, b_ref, o_ref):
    o_ref[...] = (
        jnp.dot(x_ref[...], w_ref[...], preferred_element_type=jnp.float32)
        + b_ref[...]
    )


def linear_pallas(x2d, w_t, b_row, *, bm_max=1024):
    """x2d: (B, D) f32; w_t: (D, C) f32; b_row: (1, C) f32 -> (B, C) f32."""
    B, D = x2d.shape
    C = w_t.shape[1]

    # Batch tile: multiple of 8 sublanes, capped so VMEM stays small and the
    # grid stays >= 2 for large batches. Uneven tail block handled by Pallas
    # ragged-block masking (no explicit pad / slice needed).
    BM = min(bm_max, _round_up(B, 8))
    grid = (pl.cdiv(B, BM),)

    return pl.pallas_call(
        _linear_kernel,
        out_shape=jax.ShapeDtypeStruct((B, C), jnp.float32),
        grid=grid,
        in_specs=[
            pl.BlockSpec((BM, D), lambda i: (i, 0)),   # x: tiled over batch
            pl.BlockSpec((D, C), lambda i: (0, 0)),    # weight: resident
            pl.BlockSpec((1, C), lambda i: (0, 0)),    # bias: resident
        ],
        out_specs=pl.BlockSpec((BM, C), lambda i: (i, 0)),
        compiler_params=pltpu.CompilerParams(
            dimension_semantics=("parallel",)),
        cost_estimate=pl.CostEstimate(
            flops=2 * B * D * C,
            transcendentals=0,
            bytes_accessed=B * D * 4 + D * C * 4 + C * 4 + B * C * 4),
    )(x2d, w_t, b_row)


# -----------------------------------------------------------------------------
# Module wrapper (mirrors WideResNet_classifier)
# -----------------------------------------------------------------------------
class WideResNetClassifier:
    def __init__(self, depth, num_classes, widen_factor=1, dropRate=0.0, key=None):
        assert (depth - 4) % 6 == 0
        self.nChannels = [16, 16 * widen_factor, 32 * widen_factor, 64 * widen_factor]
        self.num_classes = num_classes
        in_features = self.nChannels[3]

        if key is None:
            key = jax.random.PRNGKey(0)
        # nn.Linear default weight init; bias zeroed by the module's init loop.
        bound = 1.0 / math.sqrt(in_features)
        w = jax.random.uniform(
            key, (num_classes, in_features), dtype=jnp.float32,
            minval=-bound, maxval=bound)
        b = jnp.zeros((num_classes,), dtype=jnp.float32)

        # PyTorch-layout copies for reference checks.
        self.fc_weight = w            # (C, D)
        self.fc_bias = b              # (C,)

        # Hot-path parameters: pre-transposed (D, C), bias as a (1, C) row.
        self._w_t = jnp.asarray(w.T)                                  # (D, C)
        self._b_row = b.reshape(1, num_classes)                       # (1, C)

        # One jit region: flatten + pallas_call (no per-op dispatch, slices
        # and reshapes fuse with neighbors).
        self._forward_jit = jax.jit(self._forward_impl)

    def _forward_impl(self, x, w_t, b_row):
        # NCHW -> (B, nChannels[3]); identical to torch's x.view(-1, C) for
        # contiguous input (this head receives pooled features, H=W=1).
        out = x.reshape(-1, self.nChannels[3])
        return linear_pallas(out, w_t, b_row)

    def forward(self, x):
        return self._forward_jit(x, self._w_t, self._b_row)


if __name__ == "__main__":
    key = jax.random.PRNGKey(0)
    k_x, k_w = jax.random.split(key)

    depth = 10          # (10 - 4) % 6 == 0
    widen_factor = 1    # nChannels[3] = 64
    num_classes = 10

    model = WideResNetClassifier(depth, num_classes, widen_factor, key=k_w)

    # Typical input to this classifier head: pooled features of shape
    # (batch, 64, 1, 1) in NCHW; .view(-1, 64) -> (batch, 64).
    batch = 4
    x = jax.random.normal(k_x, (batch, model.nChannels[3], 1, 1), dtype=jnp.float32)

    logits = model.forward(x)
    jax.block_until_ready(logits)
    assert logits.shape == (batch, num_classes)

    # f32 reference (PyTorch Linear semantics). Tolerance covers the TPU MXU's
    # default f32 matmul precision.
    x2d = x.reshape(-1, model.nChannels[3])
    ref = x2d @ model.fc_weight.T + model.fc_bias
    assert jnp.allclose(logits, ref, atol=1e-2, rtol=1e-2), (
        float(jnp.max(jnp.abs(logits - ref))))

    print("KERNEL_OK")
</pallas_src>

<mosaic_0001>
module attributes {stable_mosaic.version = 11 : i64} {
  func.func @_linear_kernel(%arg0: i32, %arg1: memref<8x64xf32, #tpu.memory_space<vmem>>, %arg2: memref<64x10xf32, #tpu.memory_space<vmem>>, %arg3: memref<1x10xf32, #tpu.memory_space<vmem>>, %arg4: memref<8x10xf32, #tpu.memory_space<vmem>>) attributes {dimension_semantics = [#tpu.dimension_semantics<parallel>], iteration_bounds = array<i64: 1>, scalar_prefetch = 0 : i64, scratch_operands = 0 : i64, tpu.core_type = #tpu.core_type<tc>, window_params = [{transform_indices = @transform_0, window_bounds = array<i64: 8, 64>}, {pipeline_mode = #tpu.pipeline_mode<synchronous>, transform_indices = @transform_1, window_bounds = array<i64: 64, 10>}, {pipeline_mode = #tpu.pipeline_mode<synchronous>, transform_indices = @transform_2, window_bounds = array<i64: 1, 10>}, {transform_indices = @transform_3, window_bounds = array<i64: 8, 10>}]} {
    %c0 = arith.constant 0 : index
    %c0_0 = arith.constant 0 : index
    %0 = vector.load %arg1[%c0, %c0_0] : memref<8x64xf32, #tpu.memory_space<vmem>>, vector<8x64xf32>
    %c0_1 = arith.constant 0 : index
    %c0_2 = arith.constant 0 : index
    %1 = vector.load %arg2[%c0_1, %c0_2] : memref<64x10xf32, #tpu.memory_space<vmem>>, vector<64x10xf32>
    %cst = arith.constant dense<0.000000e+00> : vector<8x10xf32>
    %2 = tpu.matmul %0, %1, %cst {dimension_numbers = #tpu.dot_dimension_numbers<[1], [0], [0], [1], [0, 0, 1, 1], [], []>} : vector<8x64xf32>, vector<64x10xf32>, vector<8x10xf32> -> vector<8x10xf32>
    %c0_3 = arith.constant 0 : index
    %c0_4 = arith.constant 0 : index
    %3 = vector.load %arg3[%c0_3, %c0_4] : memref<1x10xf32, #tpu.memory_space<vmem>>, vector<1x10xf32>
    %4 = vector.broadcast %3 : vector<1x10xf32> to vector<8x10xf32>
    %5 = arith.addf %2, %4 : vector<8x10xf32>
    %c0_5 = arith.constant 0 : index
    %c0_6 = arith.constant 0 : index
    %6 = vector.load %arg4[%c0_5, %c0_6] : memref<8x10xf32, #tpu.memory_space<vmem>>, vector<8x10xf32>
    tpu.vector_store %arg4[%c0_5, %c0_6], %5 {strides = array<i32>} : memref<8x10xf32, #tpu.memory_space<vmem>>, vector<8x10xf32>,
    return
  }
  func.func @transform_0(%arg0: i32) -> (i32, i32) {
    %c0_i32 = arith.constant 0 : i32
    %c0_i32_0 = arith.constant 0 : i32
    return %arg0, %c0_i32 : i32, i32
  }
  func.func @transform_1(%arg0: i32) -> (i32, i32) {
    %c0_i32 = arith.constant 0 : i32
    %c0_i32_0 = arith.constant 0 : i32
    %c0_i32_1 = arith.constant 0 : i32
    return %c0_i32, %c0_i32_0 : i32, i32
  }
  func.func @transform_2(%arg0: i32) -> (i32, i32) {
    %c0_i32 = arith.constant 0 : i32
    %c0_i32_0 = arith.constant 0 : i32
    %c0_i32_1 = arith.constant 0 : i32
    return %c0_i32, %c0_i32_0 : i32, i32
  }
  func.func @transform_3(%arg0: i32) -> (i32, i32) {
    %c0_i32 = arith.constant 0 : i32
    %c0_i32_0 = arith.constant 0 : i32
    return %arg0, %c0_i32 : i32, i32
  }
}

</mosaic_0001>

<bundles_post_ra>
// kernel: _forward_impl.1
= control target key start
LH: loop header
LB: loop body
LE: loop exit
PB: predicated region body
PF: predicated region fallthrough
CT: control target
= control target key end

     0   :  { %8 = vsyncpa [#allocation3], 0  ;;  %v180_v1 = vmov 0.0   ;;  %vm181_vm0 = vmmov 0   ;;  %vm31_vm1 = vcmask 523264   ;;  %vm105_vm2 = vcmask 80896   ;;  %s238_s0 = inlined_call_operand.vmem [shape: f32[4,64], index: 0, kind: input, shape index: {}]   ;;  %s239_s1 = inlined_call_operand.vmem [shape: f32[64,10], index: 1, kind: input, shape index: {}]   ;;  %s240_s2 = inlined_call_operand.vmem [shape: f32[1,10], index: 2, kind: input, shape index: {}]   ;;  %s241_s3 = inlined_call_operand.hbm [shape: f32[4,10], index: 3, kind: output, shape index: {}]  }
   0x1   :  { %v23_v0 = vld [vmem:[%s239_s1 + $0x38] sm:$0xff]  ;;  %134 = vmatprep.subr.mxu0 %v180_v1  ;;  %v22_v2 = vld [vmem:[%s239_s1 + $0x30] sm:$0xff]  ;;  %150 = vmatprep.mubr.msk.f32.mxu0 %vm181_vm0, %v180_v1  ;;  %v21_v3 = vld [vmem:[%s239_s1 + $0x28] sm:$0xff] }
   0x2   :  { %135 = vmatpush3.msra.mxu0 %v23_v0  ;;  %v20_v4 = vld [vmem:[%s239_s1 + $0x20] sm:$0xff]  ;;  %v19_v5 = vld [vmem:[%s239_s1 + $0x18] sm:$0xff]  ;;  %v18_v6 = vld [vmem:[%s239_s1 + $0x10] sm:$0xff] }
   0x3   :  { %136 = vmatprep.subr.mxu0 %v180_v1  ;;  %v17_v7 = vld [vmem:[%s239_s1 + $0x8] sm:$0xff]  ;;  %v16_v8 = vld [vmem:[%s239_s1] sm:$0xff] }
   0x4   :  { %137 = vmatpush3.msra.mxu0 %v22_v2  ;;  %v15_v9 = vld [vmem:[%s238_s0] sm:$0xff] }
   0x5   :  { %138 = vmatprep.subr.mxu0 %v180_v1  ;;  %v123_v10 = vld [vmem:[%s240_s2] ss:$0 sm:$0xff] }
   0x6   :  { %139 = vmatpush3.msra.mxu0 %v21_v3 }
   0x7   :  { %140 = vmatprep.subr.mxu0 %v180_v1 }
   0x8   :  { %141 = vmatpush3.msra.mxu0 %v20_v4 }
   0x9   :  { %142 = vmatprep.subr.mxu0 %v180_v1 }
   0xa   :  { %143 = vmatpush3.msra.mxu0 %v19_v5 }
   0xb   :  { %144 = vmatprep.subr.mxu0 %v180_v1 }
   0xc   :  { %145 = vmatpush3.msra.mxu0 %v18_v6 }
   0xd   :  { %146 = vmatprep.subr.mxu0 %v180_v1 }
   0xe   :  { %147 = vmatpush3.msra.mxu0 %v17_v7 }
   0xf   :  { %148 = vmatprep.subr.mxu0 %v180_v1 }
  0x10   :  { %149 = vmatpush3.msra.mxu0 %v16_v8 }
  0x11   :  { %151 = vmatmul.mubr.msk.f32.vlgmr.msra.gmra.mxu0 %vm31_vm1, %v15_v9 }
  0xd1   :  { %v101_v11 = vpop.f32.mrf.mxu0 }
  0xd2   :  { %v102_v12 = vadd.f32 %v123_v10, %v101_v11 }
  0xd3   :  { %v152_v13 = vpop.f32.mrf.mxu0 }
  0xd4   :  { %106 = vst.msk [vmem:[#allocation2] sm:$0xff] %vm105_vm2, %v102_v12 }
  0xd5   :  { %111 = vsyncadd [#allocation3], 64  ;;  %s182_s1 = smov [#allocation2]  }
  0xd6   :  { %s112_s5 = sshll.u32 %s182_s1, 4  ;;  %s113_s5 = int_to_ptr.vmem [resolvable:$true] %s112_s5 }
  0xd7   :  { %s158_s6 = scalar_lea.vmem %s113_s5, 64  ;;  %s162_s0 = scalar_lea.vmem %s113_s5, 128 }
  0xd8   :  { %p159_p0 = scmp.ne.s32.totalorder %s113_s5, %s158_s6  ;;  %p163_p1 = scmp.lt.s32.totalorder %s113_s5, %s113_s5 }
  0xd9   :  { %p164_p2 = scmp.lt.s32.totalorder %s162_s0, %s158_s6 }
  0xdb   :  { %p165_p3 = por %p164_p2, %p163_p1 }
  0xdd   :  { %p166_p4 = pnand %p165_p3, %p159_p0 }
  0xdf   :  { %169 = shalt.err (!%p166_p4)
}
  0xe0   :  { %s183_s7 = smov 64   ;;  %s184_s8 = smov 4  }
  0xe1   :  { %118 = dma.vmem_to_hbm [thread:$0]  %s113_s5, 64, %s241_s3, [#allocation3], %s183_s7, %s183_s7, %s184_s8  }
  0xe2   :  { %178 = dma.done.wait [#allocation3], 128  }
  0xe3   :  { %179 = vsyncadd [#allocation3], 4294967168 }
  0xe4   :  { %122 = vsyncpa [#allocation3], 1 }

</bundles_post_ra>
